<compile_context>
chip_gen: v6e
topology: v6e:2x2x1
jax: 0.10.0
libtpu: 0.0.40
codegen_flags: <defaults>
</compile_context>

<pallas_src>
import jax
import jax.numpy as jnp
from jax.experimental import pallas as pl
from jax.experimental.pallas import tpu as pltpu


# ---------------------------------------------------------------------------
# Kernel
# ---------------------------------------------------------------------------
def _head_kernel(feat_ref, w6_ref, b6_ref, w7_ref, b7_ref, wc_ref, bc_ref,
                 x_ref, probs_ref):
    # feat_ref: [tB, C, HW] f32 -- native NCHW flatten (HW on lanes, C on sublanes)

    # --- global average pool over spatial positions (cross-lane reduce) ---
    pooled = jnp.mean(feat_ref[...], axis=-1)                       # [tB, C] f32, lane-dense

    # --- fc6 -> ReLU (bf16 MXU operands, f32 accumulation) ---
    h6 = jnp.dot(pooled.astype(jnp.bfloat16), w6_ref[...],
                 preferred_element_type=jnp.float32) + b6_ref[...]
    h6 = jnp.maximum(h6, 0.0)                                       # [tB, Hp] f32

    # --- fc7 -> ReLU ---
    h7 = jnp.dot(h6.astype(jnp.bfloat16), w7_ref[...],
                 preferred_element_type=jnp.float32) + b7_ref[...]
    h7 = jnp.maximum(h7, 0.0)                                       # [tB, Hp] f32
    x_ref[...] = h7

    # --- predictor + post-processor (softmax). Padded class lanes carry a
    #     -1e30 bias so exp() underflows to exactly 0 in f32. ---
    logits = jnp.dot(h7.astype(jnp.bfloat16), wc_ref[...],
                     preferred_element_type=jnp.float32) + bc_ref[...]   # [tB, NCp]
    m = jnp.max(logits, axis=-1, keepdims=True)
    e = jnp.exp(logits - m)
    denom = jnp.sum(e, axis=-1, keepdims=True)
    probs_ref[...] = e * pl.reciprocal(denom, approx=True)


# ---------------------------------------------------------------------------
# Wrapper
# ---------------------------------------------------------------------------
def _round_up(x, m):
    return ((x + m - 1) // m) * m


def _vmem_defaults():
    """(tiling budget bytes, vmem_limit_bytes, batch-tile cap) per generation."""
    try:
        kind = jax.devices()[0].device_kind.lower()
    except Exception:
        kind = ""
    if ("v5" in kind) or ("v6" in kind):
        # 128 MiB physical VMEM: big tiles to sit near HBM roofline.
        return 80 * (1 << 20), 100 * (1 << 20), 1024
    # Unknown / v7x: 64 MiB physical VMEM -> leave headroom for compiler scratch.
    return 36 * (1 << 20), 48 * (1 << 20), 256


def classification_head_forward(features, params, *, block_b_cap=None,
                                vmem_budget_bytes=None, vmem_limit_bytes=None):
    """ClassificationHead inference forward.

    features: [B, C, H, W] float32 (B = number of ROIs / images).
    Returns (x, probs, losses):
      x      [B, hidden]       feature-extractor output (fc7 activations)
      probs  [B, num_classes]  post-processed softmax scores
      losses {}                empty dict (inference path)
    """
    B, C, H, W = features.shape
    HW = H * W
    hidden = params["w6"].shape[1]
    num_classes = params["wc"].shape[1]

    hp = _round_up(hidden, 128)        # lane-dense hidden width
    ncp = _round_up(num_classes, 128)  # lane-dense class width

    # --- weight / bias prep (zero-pad to lane-dense widths; bf16 weights) ---
    def pad_w(a, rows, cols):
        a = a.astype(jnp.bfloat16)
        if a.shape == (rows, cols):
            return a
        return jnp.zeros((rows, cols), jnp.bfloat16).at[:a.shape[0], :a.shape[1]].set(a)

    def pad_b(a, cols, fill=0.0):
        a = a.astype(jnp.float32).reshape(1, -1)
        if a.shape[1] == cols:
            return a
        return jnp.full((1, cols), fill, jnp.float32).at[:, :a.shape[1]].set(a)

    w6p = pad_w(params["w6"], C, hp)
    b6p = pad_b(params["b6"], hp)                 # padded lanes: bias 0 -> ReLU(0)=0
    w7p = pad_w(params["w7"], hp, hp)
    b7p = pad_b(params["b7"], hp)
    wcp = pad_w(params["wc"], hp, ncp)
    bcp = pad_b(params["bc"], ncp, fill=-1e30)    # padded classes ignored by softmax

    # --- features: metadata-only reshape of contiguous NCHW; no transpose/cast/pad ---
    feat = features.reshape(B, C, HW)

    # --- batch-tile sizing (budget includes weights, outputs and temporaries) ---
    budget, limit, cap = _vmem_defaults()
    if vmem_budget_bytes is not None:
        budget = vmem_budget_bytes
    if vmem_limit_bytes is not None:
        limit = vmem_limit_bytes
    if block_b_cap is not None:
        cap = block_b_cap

    weight_bytes = 2 * 2 * (C * hp + hp * hp + hp * ncp) + 2 * 4 * (2 * hp + ncp)
    per_row_bytes = (2 * C * HW * 4               # double-buffered f32 feat block
                     + 2 * hp * 4 + 2 * ncp * 4   # double-buffered f32 x / probs blocks
                     + C * 4 + 3 * hp * 4 + 2 * ncp * 4)  # in-kernel temporaries
    tb = max(8, (budget - weight_bytes) // per_row_bytes)
    tb = max(8, min(cap, (tb // 8) * 8))
    if B <= tb:
        tb = B                                    # single tile covering the whole batch
    grid = (pl.cdiv(B, tb),)                      # ragged last tile handled by Pallas

    const2 = lambda i: (0, 0)
    x_p, probs_p = pl.pallas_call(
        _head_kernel,
        out_shape=(
            jax.ShapeDtypeStruct((B, hp), jnp.float32),    # x (fc7 output, padded lanes)
            jax.ShapeDtypeStruct((B, ncp), jnp.float32),   # softmax scores (padded lanes)
        ),
        grid=grid,
        in_specs=[
            pl.BlockSpec((tb, C, HW), lambda i: (i, 0, 0)),   # feat streamed per tile
            pl.BlockSpec((C, hp), const2),                    # weights: VMEM-resident
            pl.BlockSpec((1, hp), const2),
            pl.BlockSpec((hp, hp), const2),
            pl.BlockSpec((1, hp), const2),
            pl.BlockSpec((hp, ncp), const2),
            pl.BlockSpec((1, ncp), const2),
        ],
        out_specs=(
            pl.BlockSpec((tb, hp), lambda i: (i, 0)),
            pl.BlockSpec((tb, ncp), lambda i: (i, 0)),
        ),
        compiler_params=pltpu.CompilerParams(
            dimension_semantics=("parallel",),   # v7x: both TCs split the ROI tiles
            vmem_limit_bytes=limit,
        ),
    )(feat, w6p, b6p, w7p, b7p, wcp, bcp)

    x = x_p[:, :hidden]
    probs = probs_p[:, :num_classes]
    return x, probs, {}


def init_params(key, in_channels, hidden, num_classes):
    k6, k7, kc, kb6, kb7, kbc = jax.random.split(key, 6)
    return {
        "w6": jax.random.normal(k6, (in_channels, hidden), jnp.float32)
              / jnp.sqrt(float(in_channels)),
        "b6": 0.1 * jax.random.normal(kb6, (hidden,), jnp.float32),
        "w7": jax.random.normal(k7, (hidden, hidden), jnp.float32)
              / jnp.sqrt(float(hidden)),
        "b7": 0.1 * jax.random.normal(kb7, (hidden,), jnp.float32),
        "wc": jax.random.normal(kc, (hidden, num_classes), jnp.float32)
              / jnp.sqrt(float(hidden)),
        "bc": 0.1 * jax.random.normal(kbc, (num_classes,), jnp.float32),
    }


if __name__ == "__main__":
    key = jax.random.PRNGKey(0)
    B, C, H, W = 2, 4, 16, 16
    hidden, num_classes = 32, 8

    kf, kp = jax.random.split(key)
    features = jax.random.normal(kf, (B, C, H, W), jnp.float32)
    params = init_params(kp, C, hidden, num_classes)

    x, probs, losses = jax.jit(classification_head_forward)(features, params)
    jax.block_until_ready((x, probs))

    # pure-JAX f32 reference (kernel uses bf16 weights w/ f32 accum -> loose tol)
    pooled = jnp.mean(features.reshape(B, C, H * W), axis=-1)
    h6 = jnp.maximum(pooled @ params["w6"] + params["b6"], 0.0)
    h7 = jnp.maximum(h6 @ params["w7"] + params["b7"], 0.0)
    ref_logits = h7 @ params["wc"] + params["bc"]
    ref_probs = jax.nn.softmax(ref_logits, axis=-1)

    assert x.shape == (B, hidden)
    assert probs.shape == (B, num_classes)
    assert losses == {}
    assert jnp.allclose(x, h7, atol=5e-2, rtol=5e-2)
    assert jnp.allclose(probs, ref_probs, atol=2e-2)
    assert jnp.allclose(jnp.sum(probs, axis=-1), 1.0, atol=5e-3)

    print("KERNEL_OK")
</pallas_src>

<mosaic_0001>
module attributes {stable_mosaic.version = 11 : i64} {
  func.func @_head_kernel(%arg0: i32, %arg1: memref<2x4x256xf32, #tpu.memory_space<vmem>>, %arg2: memref<4x128xbf16, #tpu.memory_space<vmem>>, %arg3: memref<1x128xf32, #tpu.memory_space<vmem>>, %arg4: memref<128x128xbf16, #tpu.memory_space<vmem>>, %arg5: memref<1x128xf32, #tpu.memory_space<vmem>>, %arg6: memref<128x128xbf16, #tpu.memory_space<vmem>>, %arg7: memref<1x128xf32, #tpu.memory_space<vmem>>, %arg8: memref<2x128xf32, #tpu.memory_space<vmem>>, %arg9: memref<2x128xf32, #tpu.memory_space<vmem>>) attributes {dimension_semantics = [#tpu.dimension_semantics<parallel>], iteration_bounds = array<i64: 1>, scalar_prefetch = 0 : i64, scratch_operands = 0 : i64, tpu.core_type = #tpu.core_type<tc>, window_params = [{transform_indices = @transform_0, window_bounds = array<i64: 2, 4, 256>}, {pipeline_mode = #tpu.pipeline_mode<synchronous>, transform_indices = @transform_1, window_bounds = array<i64: 4, 128>}, {pipeline_mode = #tpu.pipeline_mode<synchronous>, transform_indices = @transform_2, window_bounds = array<i64: 1, 128>}, {pipeline_mode = #tpu.pipeline_mode<synchronous>, transform_indices = @transform_3, window_bounds = array<i64: 128, 128>}, {pipeline_mode = #tpu.pipeline_mode<synchronous>, transform_indices = @transform_4, window_bounds = array<i64: 1, 128>}, {pipeline_mode = #tpu.pipeline_mode<synchronous>, transform_indices = @transform_5, window_bounds = array<i64: 128, 128>}, {pipeline_mode = #tpu.pipeline_mode<synchronous>, transform_indices = @transform_6, window_bounds = array<i64: 1, 128>}, {transform_indices = @transform_7, window_bounds = array<i64: 2, 128>}, {transform_indices = @transform_8, window_bounds = array<i64: 2, 128>}]} {
    %c0 = arith.constant 0 : index
    %c0_0 = arith.constant 0 : index
    %c0_1 = arith.constant 0 : index
    %0 = vector.load %arg1[%c0, %c0_0, %c0_1] : memref<2x4x256xf32, #tpu.memory_space<vmem>>, vector<2x4x256xf32>
    %cst = arith.constant dense<0.000000e+00> : vector<2x4xf32>
    %1 = vector.multi_reduction <add>, %0, %cst [2] : vector<2x4x256xf32> to vector<2x4xf32>
    %cst_2 = arith.constant 2.560000e+02 : f32
    %2 = vector.broadcast %cst_2 : f32 to vector<2x4xf32>
    %3 = arith.divf %1, %2 : vector<2x4xf32>
    %4 = arith.truncf %3 : vector<2x4xf32> to vector<2x4xbf16>
    %c0_3 = arith.constant 0 : index
    %c0_4 = arith.constant 0 : index
    %5 = vector.load %arg2[%c0_3, %c0_4] : memref<4x128xbf16, #tpu.memory_space<vmem>>, vector<4x128xbf16>
    %cst_5 = arith.constant dense<0.000000e+00> : vector<2x128xf32>
    %6 = tpu.matmul %4, %5, %cst_5 {dimension_numbers = #tpu.dot_dimension_numbers<[1], [0], [0], [1], [0, 0, 1, 1], [], []>} : vector<2x4xbf16>, vector<4x128xbf16>, vector<2x128xf32> -> vector<2x128xf32>
    %c0_6 = arith.constant 0 : index
    %c0_7 = arith.constant 0 : index
    %7 = vector.load %arg3[%c0_6, %c0_7] : memref<1x128xf32, #tpu.memory_space<vmem>>, vector<1x128xf32>
    %8 = vector.broadcast %7 : vector<1x128xf32> to vector<2x128xf32>
    %9 = arith.addf %6, %8 : vector<2x128xf32>
    %cst_8 = arith.constant 0.000000e+00 : f32
    %10 = vector.broadcast %cst_8 : f32 to vector<2x128xf32>
    %11 = arith.maximumf %9, %10 : vector<2x128xf32>
    %12 = arith.truncf %11 : vector<2x128xf32> to vector<2x128xbf16>
    %c0_9 = arith.constant 0 : index
    %c0_10 = arith.constant 0 : index
    %13 = vector.load %arg4[%c0_9, %c0_10] : memref<128x128xbf16, #tpu.memory_space<vmem>>, vector<128x128xbf16>
    %cst_11 = arith.constant dense<0.000000e+00> : vector<2x128xf32>
    %14 = tpu.matmul %12, %13, %cst_11 {dimension_numbers = #tpu.dot_dimension_numbers<[1], [0], [0], [1], [0, 0, 1, 1], [], []>} : vector<2x128xbf16>, vector<128x128xbf16>, vector<2x128xf32> -> vector<2x128xf32>
    %c0_12 = arith.constant 0 : index
    %c0_13 = arith.constant 0 : index
    %15 = vector.load %arg5[%c0_12, %c0_13] : memref<1x128xf32, #tpu.memory_space<vmem>>, vector<1x128xf32>
    %16 = vector.broadcast %15 : vector<1x128xf32> to vector<2x128xf32>
    %17 = arith.addf %14, %16 : vector<2x128xf32>
    %cst_14 = arith.constant 0.000000e+00 : f32
    %18 = vector.broadcast %cst_14 : f32 to vector<2x128xf32>
    %19 = arith.maximumf %17, %18 : vector<2x128xf32>
    %c0_15 = arith.constant 0 : index
    %c0_16 = arith.constant 0 : index
    %20 = vector.load %arg8[%c0_15, %c0_16] : memref<2x128xf32, #tpu.memory_space<vmem>>, vector<2x128xf32>
    tpu.vector_store %arg8[%c0_15, %c0_16], %19 {strides = array<i32>} : memref<2x128xf32, #tpu.memory_space<vmem>>, vector<2x128xf32>,
    %21 = arith.truncf %19 : vector<2x128xf32> to vector<2x128xbf16>
    %c0_17 = arith.constant 0 : index
    %c0_18 = arith.constant 0 : index
    %22 = vector.load %arg6[%c0_17, %c0_18] : memref<128x128xbf16, #tpu.memory_space<vmem>>, vector<128x128xbf16>
    %cst_19 = arith.constant dense<0.000000e+00> : vector<2x128xf32>
    %23 = tpu.matmul %21, %22, %cst_19 {dimension_numbers = #tpu.dot_dimension_numbers<[1], [0], [0], [1], [0, 0, 1, 1], [], []>} : vector<2x128xbf16>, vector<128x128xbf16>, vector<2x128xf32> -> vector<2x128xf32>
    %c0_20 = arith.constant 0 : index
    %c0_21 = arith.constant 0 : index
    %24 = vector.load %arg7[%c0_20, %c0_21] : memref<1x128xf32, #tpu.memory_space<vmem>>, vector<1x128xf32>
    %25 = vector.broadcast %24 : vector<1x128xf32> to vector<2x128xf32>
    %26 = arith.addf %23, %25 : vector<2x128xf32>
    %cst_22 = arith.constant dense<0xFF800000> : vector<2xf32>
    %27 = vector.multi_reduction <maximumf>, %26, %cst_22 [1] : vector<2x128xf32> to vector<2xf32>
    %28 = vector.shape_cast %27 : vector<2xf32> to vector<2x1xf32>
    %29 = vector.broadcast %28 : vector<2x1xf32> to vector<2x128xf32>
    %30 = arith.subf %26, %29 : vector<2x128xf32>
    %31 = math.exp %30 : vector<2x128xf32>
    %cst_23 = arith.constant dense<0.000000e+00> : vector<2xf32>
    %32 = vector.multi_reduction <add>, %31, %cst_23 [1] : vector<2x128xf32> to vector<2xf32>
    %33 = vector.shape_cast %32 : vector<2xf32> to vector<2x1xf32>
    %34 = tpu.reciprocal %33 {approx = true} : vector<2x1xf32> -> vector<2x1xf32>
    %35 = vector.broadcast %34 : vector<2x1xf32> to vector<2x128xf32>
    %36 = arith.mulf %31, %35 : vector<2x128xf32>
    %c0_24 = arith.constant 0 : index
    %c0_25 = arith.constant 0 : index
    %37 = vector.load %arg9[%c0_24, %c0_25] : memref<2x128xf32, #tpu.memory_space<vmem>>, vector<2x128xf32>
    tpu.vector_store %arg9[%c0_24, %c0_25], %36 {strides = array<i32>} : memref<2x128xf32, #tpu.memory_space<vmem>>, vector<2x128xf32>,
    return
  }
  func.func @transform_0(%arg0: i32) -> (i32, i32, i32) {
    %c0_i32 = arith.constant 0 : i32
    %c0_i32_0 = arith.constant 0 : i32
    %c0_i32_1 = arith.constant 0 : i32
    return %arg0, %c0_i32, %c0_i32_0 : i32, i32, i32
  }
  func.func @transform_1(%arg0: i32) -> (i32, i32) {
    %c0_i32 = arith.constant 0 : i32
    %c0_i32_0 = arith.constant 0 : i32
    %c0_i32_1 = arith.constant 0 : i32
    return %c0_i32, %c0_i32_0 : i32, i32
  }
  func.func @transform_2(%arg0: i32) -> (i32, i32) {
    %c0_i32 = arith.constant 0 : i32
    %c0_i32_0 = arith.constant 0 : i32
    %c0_i32_1 = arith.constant 0 : i32
    return %c0_i32, %c0_i32_0 : i32, i32
  }
  func.func @transform_3(%arg0: i32) -> (i32, i32) {
    %c0_i32 = arith.constant 0 : i32
    %c0_i32_0 = arith.constant 0 : i32
    %c0_i32_1 = arith.constant 0 : i32
    return %c0_i32, %c0_i32_0 : i32, i32
  }
  func.func @transform_4(%arg0: i32) -> (i32, i32) {
    %c0_i32 = arith.constant 0 : i32
    %c0_i32_0 = arith.constant 0 : i32
    %c0_i32_1 = arith.constant 0 : i32
    return %c0_i32, %c0_i32_0 : i32, i32
  }
  func.func @transform_5(%arg0: i32) -> (i32, i32) {
    %c0_i32 = arith.constant 0 : i32
    %c0_i32_0 = arith.constant 0 : i32
    %c0_i32_1 = arith.constant 0 : i32
    return %c0_i32, %c0_i32_0 : i32, i32
  }
  func.func @transform_6(%arg0: i32) -> (i32, i32) {
    %c0_i32 = arith.constant 0 : i32
    %c0_i32_0 = arith.constant 0 : i32
    %c0_i32_1 = arith.constant 0 : i32
    return %c0_i32, %c0_i32_0 : i32, i32
  }
  func.func @transform_7(%arg0: i32) -> (i32, i32) {
    %c0_i32 = arith.constant 0 : i32
    %c0_i32_0 = arith.constant 0 : i32
    return %arg0, %c0_i32 : i32, i32
  }
  func.func @transform_8(%arg0: i32) -> (i32, i32) {
    %c0_i32 = arith.constant 0 : i32
    %c0_i32_0 = arith.constant 0 : i32
    return %arg0, %c0_i32 : i32, i32
  }
}

</mosaic_0001>

<bundles_post_ra>
// kernel: classification_head_forward.1
= control target key start
LH: loop header
LB: loop body
LE: loop exit
PB: predicated region body
PF: predicated region fallthrough
CT: control target
= control target key end

     0   :  { %14 = vsyncpa [#allocation3], 0  ;;  %vm39_vm0 = vcmask 1043456   ;;  %s698_s0 = inlined_call_operand.vmem [shape: f32[2,4,256], index: 0, kind: input, shape index: {}]   ;;  %s699_s1 = inlined_call_operand.vmem [shape: bf16[4,128], index: 1, kind: input, shape index: {}]   ;;  %s700_s2 = inlined_call_operand.vmem [shape: f32[1,128], index: 2, kind: input, shape index: {}]   ;;  %s701_s3 = inlined_call_operand.vmem [shape: bf16[128,128], index: 3, kind: input, shape index: {}]   ;;  %s702_s4 = inlined_call_operand.vmem [shape: f32[1,128], index: 4, kind: input, shape index: {}]   ;;  %s703_s5 = inlined_call_operand.vmem [shape: bf16[128,128], index: 5, kind: input, shape index: {}]   ;;  %s704_s6 = inlined_call_operand.vmem [shape: f32[1,128], index: 6, kind: input, shape index: {}]   ;;  %s705_s7 = inlined_call_operand.hbm [shape: f32[2,128], index: 7, kind: output, shape index: {0}]   ;;  %s706_s8 = inlined_call_operand.hbm [shape: f32[2,128], index: 8, kind: output, shape index: {1}]  }
   0x1   :  { %v31_v0 = vld [vmem:[%s698_s0] sm:$0xff]  ;;  %v32_v1 = vld [vmem:[%s698_s0 + $0x8] sm:$0xff] }
   0x2   :  { %v35_v2 = vcombine.high %v31_v0, %v31_v0  ;;  %v40_v3 = vsel %vm39_vm0, %v31_v0, 0.0  ;;  %v36_v4 = vcombine.high %v32_v1, %v32_v1  ;;  %v45_v5 = vsel %vm39_vm0, %v32_v1, 0.0 }
   0x4   :  { %v41_v6 = vsel %vm39_vm0, %v35_v2, 0.0  ;;  %v46_v7 = vsel %vm39_vm0, %v36_v4, 0.0 }
   0x5   :  { %v42_v8 = vadd.f32 %v41_v6, %v40_v3  ;;  %v47_v9 = vadd.f32 %v46_v7, %v45_v5 }
   0x7   :  { %43 = vadd.xlane.f32.xlu0 %v42_v8 }
   0xb   :  { %48 = vadd.xlane.f32.xlu0 %v47_v9 }
   0xc   :  { %15 = vsyncpa [#allocation5], 0  ;;  %v55_v10 = vld [vmem:[%s699_s1] sm:$0x3]  ;;  %vm84_vm1 = vcmask 1041408   ;;  %v551_v11 = vmov 0.0   ;;  %v67_v19 = vlaneseq }
   0xd   :  { %435 = vmatprep.subr.bf16.mxu0 %v551_v11  ;;  %v86_v12 = vsel %vm84_vm1, %v55_v10, 0  ;;  %441 = vmatprep.subr.bf16.mxu1 %v551_v11  ;;  %vm552_vm2 = vmmov 0   ;;  %v487_v13 = vld [vmem:[%s701_s3 + $0x38] sm:$0xff]   ;;  %v488_v14 = vld [vmem:[%s701_s3 + $0x30] sm:$0xff]   ;;  %v489_v15 = vld [vmem:[%s701_s3 + $0x28] sm:$0xff]   ;;  %vm77_vm3 = vcmask 1041409  }
   0xe   :  { %436 = vmatpush3.bf16.msra.mxu0 %v86_v12  ;;  %437 = vmatprep.mubr.msk.bf16.mxu0 %vm552_vm2, %v551_v11  ;;  %v490_v16 = vld [vmem:[%s701_s3 + $0x20] sm:$0xff]   ;;  %v491_v17 = vld [vmem:[%s701_s3 + $0x18] sm:$0xff]   ;;  %v492_v18 = vld [vmem:[%s701_s3 + $0x10] sm:$0xff]   ;;  %v68_v22 = vand.u32 127, %v67_v19  ;;  %v70_v23 = vshrl.u32 %v67_v19, 7  ;;  %vm80_vm4 = vcmask 31744  }
   0xf   :  { %457 = vmatprep.mubr.msk.bf16.mxu1 %vm552_vm2, %v551_v11  ;;  %461 = vmatprep.subr.bf16.mxu0 %v551_v11  ;;  %v493_v35 = vld [vmem:[%s701_s3 + $0x8] sm:$0xff]   ;;  %v494_v36 = vld [vmem:[%s701_s3] sm:$0xff]   ;;  %v495_v37 = vld [vmem:[%s703_s5 + $0x38] sm:$0xff]  }
  0x10   :  { %442 = vmatpush3.bf16.msra.mxu1 %v487_v13  ;;  %v71_v27 = vsub.s32 %v68_v22, %v70_v23  ;;  %v496_v38 = vld [vmem:[%s703_s5 + $0x30] sm:$0xff]   ;;  %v497_v39 = vld [vmem:[%s703_s5 + $0x28] sm:$0xff]   ;;  %v498_v40 = vld [vmem:[%s703_s5 + $0x20] sm:$0xff]  }
  0x11   :  { %443 = vmatprep.subr.bf16.mxu1 %v551_v11  ;;  %v499_v41 = vld [vmem:[%s703_s5 + $0x18] sm:$0xff]   ;;  %v500_v42 = vld [vmem:[%s703_s5 + $0x10] sm:$0xff]   ;;  %v395_v43 = vld [vmem:[%s700_s2] ss:$0 sm:$0xff] }
  0x12   :  { %v501_v51 = vld [vmem:[%s703_s5 + $0x8] sm:$0xff]   ;;  %v502_v52 = vld [vmem:[%s703_s5] sm:$0xff]  }
  0x13   :  { %v397_v53 = vld [vmem:[%s702_s4] ss:$0 sm:$0xff]  ;;  %s553_s4 = smov [#allocation2]  }
  0x14   :  { %444 = vmatpush3.bf16.msra.mxu1 %v488_v14  ;;  %v406_v61 = vld [vmem:[%s704_s6] ss:$0 sm:$0xff]  ;;  %s373_s5 = sshll.u32 %s553_s4, 4  ;;  %s374_s5 = int_to_ptr.vmem [resolvable:$true] %s373_s5 }
  0x15   :  { %445 = vmatprep.subr.bf16.mxu1 %v551_v11  ;;  %s507_s6 = scalar_lea.vmem %s374_s5, 32  ;;  %p512_p1 = scmp.lt.s32.totalorder %s374_s5, %s374_s5 }
  0x16   :  { %p508_p0 = scmp.ne.s32.totalorder %s374_s5, %s507_s6  ;;  %p513_p2 = scmp.lt.s32.totalorder %s507_s6, %s507_s6 }
  0x18   :  { %446 = vmatpush3.bf16.msra.mxu1 %v489_v15  ;;  %p514_p3 = por %p513_p2, %p512_p1 }
  0x19   :  { %447 = vmatprep.subr.bf16.mxu1 %v551_v11 }
  0x1a   :  { %p515_p4 = pnand %p514_p3, %p508_p0 }
  0x1c   :  { %448 = vmatpush3.bf16.msra.mxu1 %v490_v16 }
  0x1d   :  { %449 = vmatprep.subr.bf16.mxu1 %v551_v11 }
  0x20   :  { %450 = vmatpush3.bf16.msra.mxu1 %v491_v17 }
  0x21   :  { %451 = vmatprep.subr.bf16.mxu1 %v551_v11 }
  0x24   :  { %452 = vmatpush3.bf16.msra.mxu1 %v492_v18 }
  0x25   :  { %453 = vmatprep.subr.bf16.mxu1 %v551_v11 }
  0x28   :  { %454 = vmatpush3.bf16.msra.mxu1 %v493_v35 }
  0x29   :  { %455 = vmatprep.subr.bf16.mxu1 %v551_v11 }
  0x2c   :  { %456 = vmatpush3.bf16.msra.mxu1 %v494_v36 }
  0x90   :  { %v44_v20 = vpop.xlane.xlu0 %43 }
  0x91   :  { %v51_v21 = vmul.f32 0.00390625, %v44_v20 }
  0x93   :  { %v53_v24 = vpack.c.bf16 %v51_v21, %v51_v21 }
  0x94   :  { %v49_v25 = vpop.xlane.xlu0 %48 }
  0x95   :  { %v52_v26 = vmul.f32 0.00390625, %v49_v25  ;;  %v65_v28 = vunpack.c.l.b16 %v53_v24 }
  0x97   :  { %v54_v29 = vpack.c.bf16 %v52_v26, %v52_v26  ;;  %v72_v31 = vrot.slane %v65_v28, %v71_v27 }
  0x99   :  { %v66_v30 = vunpack.c.l.b16 %v54_v29 }
  0x9b   :  { %v76_v32 = vrot.slane %v66_v30, %v71_v27 }
  0x9d   :  { %v78_v33 = vsel %vm77_vm3, %v76_v32, %v72_v31 }
  0x9e   :  { %v79_v34 = vpack.c.b16 %v78_v33, %v78_v33 }
  0xa0   :  { %438 = vmatmul.mubr.msk.bf16.vlgmr.msra.gmra.mxu0 %vm80_vm4, %v79_v34 }
  0xa1   :  { %477 = vmatprep.mubr.msk.bf16.mxu0 %vm552_vm2, %v551_v11  ;;  %462 = vmatpush3.bf16.msra.mxu0 %v495_v37 }
  0xa2   :  { %463 = vmatprep.subr.bf16.mxu0 %v551_v11 }
  0xa5   :  { %464 = vmatpush3.bf16.msra.mxu0 %v496_v38 }
  0xa6   :  { %465 = vmatprep.subr.bf16.mxu0 %v551_v11 }
  0xa9   :  { %466 = vmatpush3.bf16.msra.mxu0 %v497_v39 }
  0xaa   :  { %467 = vmatprep.subr.bf16.mxu0 %v551_v11 }
  0xad   :  { %468 = vmatpush3.bf16.msra.mxu0 %v498_v40 }
  0xae   :  { %469 = vmatprep.subr.bf16.mxu0 %v551_v11 }
  0xb1   :  { %470 = vmatpush3.bf16.msra.mxu0 %v499_v41 }
  0xb2   :  { %471 = vmatprep.subr.bf16.mxu0 %v551_v11 }
  0xb5   :  { %472 = vmatpush3.bf16.msra.mxu0 %v500_v42 }
  0xb6   :  { %473 = vmatprep.subr.bf16.mxu0 %v551_v11 }
  0xb9   :  { %474 = vmatpush3.bf16.msra.mxu0 %v501_v51 }
  0xba   :  { %475 = vmatprep.subr.bf16.mxu0 %v551_v11 }
  0xbd   :  { %476 = vmatpush3.bf16.msra.mxu0 %v502_v52 }
 0x160   :  { %v122_v44 = vpop.f32.mrf.mxu0 }
 0x161   :  { %v123_v45 = vadd.f32 %v395_v43, %v122_v44 }
 0x162   :  { %v439_v46 = vpop.f32.mrf.mxu0 }
 0x163   :  { %v128_v47 = vmax.f32 %v123_v45, 0.0 }
 0x164   :  { %v125_v48 = vpop.f32.mrf.mxu0 }
 0x165   :  { %v129_v49 = vpack.c.bf16 %v128_v47, %v128_v47 }
 0x166   :  { %v440_v50 = vpop.f32.mrf.mxu0 }
 0x167   :  { %458 = vmatmul.mubr.bf16.vlgmr.msra.gmra.mxu1 %v129_v49 }
 0x227   :  { %v235_v54 = vpop.f32.mrf.mxu1 }
 0x228   :  { %v236_v55 = vadd.f32 %v397_v53, %v235_v54 }
 0x229   :  { %v459_v56 = vpop.f32.mrf.mxu1 }
 0x22a   :  { %v241_v57 = vmax.f32 %v236_v55, 0.0 }
 0x22b   :  { %v238_v58 = vpop.f32.mrf.mxu1 }
 0x22c   :  { %v243_v59 = vpack.c.bf16 %v241_v57, %v241_v57  ;;  %242 = vst [vmem:[#allocation2] sm:$0x3] %v241_v57 }
 0x22d   :  { %v460_v60 = vpop.f32.mrf.mxu1 }
 0x22e   :  { %478 = vmatmul.mubr.bf16.vlgmr.msra.gmra.mxu0 %v243_v59 }
 0x2ee   :  { %v349_v62 = vpop.f32.mrf.mxu0 }
 0x2ef   :  { %v350_v63 = vadd.f32 %v406_v61, %v349_v62 }
 0x2f0   :  { %v479_v0 = vpop.f32.mrf.mxu0 }
 0x2f1   :  { %v355_v1 = vsel %vm84_vm1, %v350_v63, -inf }
 0x2f2   :  { %356 = vmax.xlane.f32.xlu1 %v355_v1  ;;  %v352_v2 = vpop.f32.mrf.mxu0 }
 0x2f4   :  { %v480_v3 = vpop.f32.mrf.mxu0 }
 0x37b   :  { %v357_v4 = vpop.xlane.xlu1 %356 }
 0x37c   :  { %v358_v5 = vsub.f32 %v350_v63, %v357_v4 }
 0x37e   :  { %v359_v6 = vmul.f32 1.442695, %v358_v5 }
 0x380   :  { %503 = vpow2.f32 %v359_v6 }
 0x38d   :  { %v504_v7 = vpop.eup %503 }
 0x38e   :  { %v361_v8 = vsel %vm84_vm1, %v504_v7, 0.0 }
 0x38f   :  { %362 = vadd.xlane.f32.xlu1 %v361_v8 }
 0x390   :  { %518 = shalt.err (!%p515_p4)
}
 0x391   :  { %376 = dma.vmem_to_hbm [thread:$0]  %s374_s5, 32, %s705_s7, [#allocation3]  }
 0x392   :  { %s554_s23 = smov [#allocation4]  }
 0x393   :  { %s383_s24 = sshll.u32 %s554_s23, 4  ;;  %s384_s24 = int_to_ptr.vmem [resolvable:$true] %s383_s24 }
 0x394   :  { %s527_s25 = scalar_lea.vmem %s384_s24, 32  ;;  %p532_p6 = scmp.lt.s32.totalorder %s384_s24, %s384_s24 }
 0x395   :  { %p528_p5 = scmp.ne.s32.totalorder %s384_s24, %s527_s25  ;;  %p533_p7 = scmp.lt.s32.totalorder %s527_s25, %s527_s25 }
 0x397   :  { %p534_p8 = por %p533_p7, %p532_p6 }
 0x399   :  { %p535_p9 = pnand %p534_p8, %p528_p5 }
 0x418   :  { %v363_v9 = vpop.xlane.xlu1 %362 }
 0x419   :  { %505 = vrcp.f32 %v363_v9 }
 0x426   :  { %v506_v10 = vpop.eup %505 }
 0x427   :  { %v365_v11 = vmul.f32 %v506_v10, %v504_v7 }
 0x429   :  { %366 = vst [vmem:[#allocation4] sm:$0x3] %v365_v11 }
 0x42a   :  { %538 = shalt.err (!%p535_p9)
}
 0x42b   :  { %386 = dma.vmem_to_hbm [thread:$0]  %s384_s24, 32, %s706_s8, [#allocation5]  }
 0x42c   :  { %547 = dma.done.wait [#allocation3], 32  }
 0x42d   :  { %548 = vsyncadd [#allocation3], 4294967264 }
 0x42e   :  { %549 = dma.done.wait [#allocation5], 32  }
 0x42f   :  { %550 = vsyncadd [#allocation5], 4294967264 }
 0x430   :  { %393 = vsyncpa [#allocation3], 1 }
 0x431   :  { %394 = vsyncpa [#allocation5], 1 }

</bundles_post_ra>
